<compile_context>
chip_gen: v7x
topology: tpu7x:2x2x1
jax: 0.10.0
libtpu: 0.0.40
codegen_flags: <defaults>
</compile_context>

<pallas_src>
import functools

import jax
import jax.numpy as jnp
from jax.experimental import pallas as pl
from jax.experimental.pallas import tpu as pltpu

LN_EPS = 1e-5  # nn.LayerNorm default


def _prenorm_linear_kernel(x_ref, w_ref, b_ref, o_ref, xn_ref, *, inv_d):
    """Fused LayerNorm(last dim) + Linear on one (TR, D) x (D, TN) tile.

    x_ref : (TR, D)  f32 rows = batch*seq tile (ragged tail masked by Pallas)
    w_ref : (D, TN)  bf16 gamma-folded projection weight
    b_ref : (1, TN)  f32 beta-folded projection bias
    o_ref : (TR, TN) output tile
    xn_ref: (TR, D)  bf16 VMEM scratch holding normalized x for this row tile
    """
    # LayerNorm is computed once per row tile (j == 0) and cached; subsequent
    # H tiles reuse the bf16 normalized activations from VMEM scratch.
    @pl.when(pl.program_id(1) == 0)
    def _():
        x = x_ref[...].astype(jnp.float32)
        # One-pass statistics in f32 (clamped variance avoids NaN from
        # cancellation); padding-free because D is the full feature dim.
        s = jnp.sum(x, axis=-1, keepdims=True)
        s2 = jnp.sum(x * x, axis=-1, keepdims=True)
        mean = s * inv_d
        var = jnp.maximum(s2 * inv_d - mean * mean, 0.0)
        xn = (x - mean) * jax.lax.rsqrt(var + LN_EPS)
        xn_ref[...] = xn.astype(xn_ref.dtype)

    # fn = Linear(dim, hidden) with the LN affine folded into w/b.
    # bf16 x bf16 -> f32 accumulate on the MXU.
    o_ref[...] = (
        jnp.dot(xn_ref[...], w_ref[...], preferred_element_type=jnp.float32)
        + b_ref[...].astype(jnp.float32)
    ).astype(o_ref.dtype)


def _round_up(a, m):
    return (a + m - 1) // m * m


def _vmem_capacity_bytes():
    try:
        return int(pltpu.get_tpu_info().vmem_capacity_bytes)
    except Exception:  # pragma: no cover - conservative fallback (v7x-sized)
        return 64 << 20


def _tr_candidates(R, tr_target):
    """Row-tile candidates: multiples of 8, <= R (or full R when R < 8)."""
    if R < 8:
        return [R]
    cap = max(8, min(tr_target, (R // 8) * 8))
    cands = []
    for c in (cap, 512, 384, 256, 128, 64, 32, 16, 8):
        c = min(c, cap)
        if c % 8 == 0 and c not in cands:
            cands.append(c)
    return cands


def _choose_tiles(R, D, H, x_bytes, out_bytes, budget, tr_target):
    """Pick (TR, TN) so double-buffered tiles + scratch fit the VMEM budget."""
    Dl = _round_up(D, 128)  # lane-padded width as laid out in VMEM

    def need(tr, tn):
        tnl = _round_up(tn, 128)
        return (2 * tr * Dl * x_bytes        # x tile, double-buffered
                + 2 * Dl * tnl * 2           # bf16 weight tile, double-buffered
                + 2 * tr * tnl * out_bytes   # out tile, double-buffered
                + 2 * tnl * 4                # bias
                + tr * Dl * 2)               # xn scratch (bf16)

    tr_cands = _tr_candidates(R, tr_target)

    # Pass 1: full-H output tile (weight truly resident), keep TR reasonably big.
    big_tr = [t for t in tr_cands if t >= 128] or tr_cands
    for tr in big_tr:
        if need(tr, H) <= budget:
            return tr, H, need(tr, H)

    # Pass 2: tile H (lane-dense multiples of 128); weight re-streamed but LN
    # is cached in scratch so it is not recomputed per H tile.
    if H > 128:
        for tn in (512, 256, 128):
            if tn >= H:
                continue
            for tr in tr_cands:
                if need(tr, tn) <= budget:
                    return tr, tn, need(tr, tn)

    # Pass 3: full-H with a tiny row tile (small-problem / last resort).
    for tr in tr_cands:
        if need(tr, H) <= budget:
            return tr, H, need(tr, H)

    tr = tr_cands[-1]
    tn = H if H <= 128 else 128
    return tr, tn, need(tr, tn)


def prenorm_linear(x, gamma, beta, w, b, *, tr_target=None, out_dtype=None):
    """PreNorm(dim, Linear(dim, hidden)) forward.

    x: (B, S, D) -> (B, S, H), H = w.shape[1].
    """
    B, S, D = x.shape
    H = w.shape[1]
    R = B * S

    out_dtype = out_dtype or x.dtype
    x_bytes = jnp.dtype(jnp.float32).itemsize
    out_bytes = jnp.dtype(out_dtype).itemsize

    # Fold the LayerNorm affine into the projection (once, in XLA):
    #   (xn * gamma + beta) @ w + b == xn @ (gamma[:,None] * w) + (b + beta @ w)
    w_f32 = w.astype(jnp.float32)
    w_eff = (gamma.astype(jnp.float32)[:, None] * w_f32).astype(jnp.bfloat16)
    b_eff = (b.astype(jnp.float32)
             + beta.astype(jnp.float32) @ w_f32).reshape(1, H)

    # Generation-aware VMEM budget (v7x: 64 MiB physical; v5e/v6e: 128 MiB).
    cap = _vmem_capacity_bytes()
    budget = int(cap * 0.70)          # tile-fit budget, leaves Mosaic headroom
    if tr_target is None:
        tr_target = 512 if cap >= (100 << 20) else 256

    TR, TN, needed = _choose_tiles(R, D, H, x_bytes, out_bytes, budget, tr_target)

    grid = (pl.cdiv(R, TR), pl.cdiv(H, TN))

    vmem_limit = int(min(int(cap * 0.85), max(2 * needed, 32 << 20)))

    xf = x.reshape(R, D).astype(jnp.float32)   # f32 for LN-statistics fidelity

    kernel = functools.partial(_prenorm_linear_kernel, inv_d=1.0 / D)

    out = pl.pallas_call(
        kernel,
        out_shape=jax.ShapeDtypeStruct((R, H), out_dtype),
        grid=grid,
        in_specs=[
            pl.BlockSpec((TR, D), lambda i, j: (i, 0)),   # x: tiled over rows
            pl.BlockSpec((D, TN), lambda i, j: (0, j)),   # w: constant over rows
            pl.BlockSpec((1, TN), lambda i, j: (0, j)),   # b: constant over rows
        ],
        out_specs=pl.BlockSpec((TR, TN), lambda i, j: (i, j)),
        scratch_shapes=[pltpu.VMEM((TR, D), jnp.bfloat16)],  # cached xn
        compiler_params=pltpu.CompilerParams(
            dimension_semantics=("parallel", "arbitrary"),
            vmem_limit_bytes=vmem_limit,
        ),
    )(xf, w_eff, b_eff)

    return out.reshape(B, S, H)


def _reference(x, gamma, beta, w, b):
    # Pure-f32 PyTorch semantics: LayerNorm(dim) then Linear.
    mean = jnp.mean(x, axis=-1, keepdims=True)
    var = jnp.mean((x - mean) ** 2, axis=-1, keepdims=True)
    xn = (x - mean) / jnp.sqrt(var + LN_EPS)
    y = xn * gamma + beta
    return jnp.einsum("bsd,dh->bsh", y, w) + b


if __name__ == "__main__":
    key = jax.random.PRNGKey(0)
    B, S, D, H = 2, 8, 32, 32

    k_x, k_g, k_b, k_w, k_bias = jax.random.split(key, 5)
    x = jax.random.normal(k_x, (B, S, D), dtype=jnp.float32)

    # PreNorm parameters: nn.LayerNorm(dim) -> weight (D,), bias (D,)
    # (PyTorch inits these to ones/zeros; perturb so the affine is exercised.)
    gamma = jnp.ones((D,), jnp.float32) + 0.05 * jax.random.normal(k_g, (D,), jnp.float32)
    beta = 0.05 * jax.random.normal(k_b, (D,), jnp.float32)

    # fn = Linear(dim, hidden): weight (D, H), bias (H,)
    w = jax.random.normal(k_w, (D, H), dtype=jnp.float32) / jnp.sqrt(D)
    bias = 0.01 * jax.random.normal(k_bias, (H,), dtype=jnp.float32)

    out = prenorm_linear(x, gamma, beta, w, bias)
    out = jax.block_until_ready(out)

    ref = _reference(x, gamma, beta, w, bias)
    assert out.shape == (B, S, H)
    # Tolerance accounts for the bf16 MXU path (stats stay f32).
    assert jnp.max(jnp.abs(out - ref)) < 5e-2

    print("KERNEL_OK")
</pallas_src>

<mosaic_0001>
module attributes {stable_mosaic.version = 11 : i64} {
  func.func @_prenorm_linear_kernel(%arg0: i32, %arg1: i32, %arg2: memref<16x32xf32, #tpu.memory_space<vmem>>, %arg3: memref<32x32xbf16, #tpu.memory_space<vmem>>, %arg4: memref<1x32xf32, #tpu.memory_space<vmem>>, %arg5: memref<16x32xf32, #tpu.memory_space<vmem>>, %arg6: memref<16x32xbf16, #tpu.memory_space<vmem>>) attributes {dimension_semantics = [#tpu.dimension_semantics<parallel>, #tpu.dimension_semantics<arbitrary>], iteration_bounds = array<i64: 1, 1>, scalar_prefetch = 0 : i64, scratch_operands = 1 : i64, tpu.core_type = #tpu.core_type<tc>, window_params = [{transform_indices = @transform_0, window_bounds = array<i64: 16, 32>}, {transform_indices = @transform_1, window_bounds = array<i64: 32, 32>}, {transform_indices = @transform_2, window_bounds = array<i64: 1, 32>}, {transform_indices = @transform_3, window_bounds = array<i64: 16, 32>}]} {
    %c0_i32 = arith.constant 0 : i32
    %0 = arith.cmpi eq, %arg1, %c0_i32 : i32
    %1 = arith.extui %0 : i1 to i32
    %c0_i32_0 = arith.constant 0 : i32
    %2 = arith.cmpi ne, %1, %c0_i32_0 : i32
    scf.if %2 {
      %c0_8 = arith.constant 0 : index
      %c0_9 = arith.constant 0 : index
      %10 = vector.load %arg2[%c0_8, %c0_9] : memref<16x32xf32, #tpu.memory_space<vmem>>, vector<16x32xf32>
      %cst_10 = arith.constant dense<0.000000e+00> : vector<16xf32>
      %11 = vector.multi_reduction <add>, %10, %cst_10 [1] : vector<16x32xf32> to vector<16xf32>
      %12 = vector.shape_cast %11 : vector<16xf32> to vector<16x1xf32>
      %13 = arith.mulf %10, %10 : vector<16x32xf32>
      %cst_11 = arith.constant dense<0.000000e+00> : vector<16xf32>
      %14 = vector.multi_reduction <add>, %13, %cst_11 [1] : vector<16x32xf32> to vector<16xf32>
      %15 = vector.shape_cast %14 : vector<16xf32> to vector<16x1xf32>
      %cst_12 = arith.constant 3.125000e-02 : f32
      %16 = vector.broadcast %cst_12 : f32 to vector<16x1xf32>
      %17 = arith.mulf %12, %16 : vector<16x1xf32>
      %cst_13 = arith.constant 3.125000e-02 : f32
      %18 = vector.broadcast %cst_13 : f32 to vector<16x1xf32>
      %19 = arith.mulf %15, %18 : vector<16x1xf32>
      %20 = arith.mulf %17, %17 : vector<16x1xf32>
      %21 = arith.subf %19, %20 : vector<16x1xf32>
      %cst_14 = arith.constant 0.000000e+00 : f32
      %22 = vector.broadcast %cst_14 : f32 to vector<16x1xf32>
      %23 = arith.maximumf %21, %22 : vector<16x1xf32>
      %24 = vector.broadcast %17 : vector<16x1xf32> to vector<16x32xf32>
      %25 = arith.subf %10, %24 : vector<16x32xf32>
      %cst_15 = arith.constant 9.99999974E-6 : f32
      %26 = vector.broadcast %cst_15 : f32 to vector<16x1xf32>
      %27 = arith.addf %23, %26 : vector<16x1xf32>
      %28 = math.rsqrt %27 : vector<16x1xf32>
      %29 = vector.broadcast %28 : vector<16x1xf32> to vector<16x32xf32>
      %30 = arith.mulf %25, %29 : vector<16x32xf32>
      %31 = arith.truncf %30 : vector<16x32xf32> to vector<16x32xbf16>
      %c0_16 = arith.constant 0 : index
      %c0_17 = arith.constant 0 : index
      %32 = vector.load %arg6[%c0_16, %c0_17] : memref<16x32xbf16, #tpu.memory_space<vmem>>, vector<16x32xbf16>
      tpu.vector_store %arg6[%c0_16, %c0_17], %31 {strides = array<i32>} : memref<16x32xbf16, #tpu.memory_space<vmem>>, vector<16x32xbf16>,
    } else {
    }
    %c0 = arith.constant 0 : index
    %c0_1 = arith.constant 0 : index
    %3 = vector.load %arg6[%c0, %c0_1] : memref<16x32xbf16, #tpu.memory_space<vmem>>, vector<16x32xbf16>
    %c0_2 = arith.constant 0 : index
    %c0_3 = arith.constant 0 : index
    %4 = vector.load %arg3[%c0_2, %c0_3] : memref<32x32xbf16, #tpu.memory_space<vmem>>, vector<32x32xbf16>
    %cst = arith.constant dense<0.000000e+00> : vector<16x32xf32>
    %5 = tpu.matmul %3, %4, %cst {dimension_numbers = #tpu.dot_dimension_numbers<[1], [0], [0], [1], [0, 0, 1, 1], [], []>} : vector<16x32xbf16>, vector<32x32xbf16>, vector<16x32xf32> -> vector<16x32xf32>
    %c0_4 = arith.constant 0 : index
    %c0_5 = arith.constant 0 : index
    %6 = vector.load %arg4[%c0_4, %c0_5] : memref<1x32xf32, #tpu.memory_space<vmem>>, vector<1x32xf32>
    %7 = vector.broadcast %6 : vector<1x32xf32> to vector<16x32xf32>
    %8 = arith.addf %5, %7 : vector<16x32xf32>
    %c0_6 = arith.constant 0 : index
    %c0_7 = arith.constant 0 : index
    %9 = vector.load %arg5[%c0_6, %c0_7] : memref<16x32xf32, #tpu.memory_space<vmem>>, vector<16x32xf32>
    tpu.vector_store %arg5[%c0_6, %c0_7], %8 {strides = array<i32>} : memref<16x32xf32, #tpu.memory_space<vmem>>, vector<16x32xf32>,
    return
  }
  func.func @transform_0(%arg0: i32, %arg1: i32) -> (i32, i32) {
    %c0_i32 = arith.constant 0 : i32
    %c0_i32_0 = arith.constant 0 : i32
    return %arg0, %c0_i32 : i32, i32
  }
  func.func @transform_1(%arg0: i32, %arg1: i32) -> (i32, i32) {
    %c0_i32 = arith.constant 0 : i32
    %c0_i32_0 = arith.constant 0 : i32
    return %c0_i32, %arg1 : i32, i32
  }
  func.func @transform_2(%arg0: i32, %arg1: i32) -> (i32, i32) {
    %c0_i32 = arith.constant 0 : i32
    %c0_i32_0 = arith.constant 0 : i32
    return %c0_i32, %arg1 : i32, i32
  }
  func.func @transform_3(%arg0: i32, %arg1: i32) -> (i32, i32) {
    %c0_i32 = arith.constant 0 : i32
    return %arg0, %arg1 : i32, i32
  }
}

</mosaic_0001>

<bundles_post_ra>
// kernel: tpu_custom_call.1
= control target key start
LH: loop header
LB: loop body
LE: loop exit
PB: predicated region body
PF: predicated region fallthrough
CT: control target
= control target key end

     0   :  { %8 = vsyncpa [#allocation4], 0  ;;  %s358_s0 = inlined_call_operand.hbm [shape: f32[16,32], index: 0, kind: input, shape index: {}]   ;;  %s359_s1 = inlined_call_operand.hbm [shape: bf16[32,32], index: 1, kind: input, shape index: {}]   ;;  %s360_s2 = inlined_call_operand.vmem [shape: f32[1,32], index: 2, kind: input, shape index: {}]   ;;  %s361_s3 = inlined_call_operand.hbm [shape: f32[16,32], index: 3, kind: output, shape index: {}]  }
   0x1   :  { %9 = vsyncpa [#allocation7], 0 }
   0x2   :  { %10 = vsyncpa [#allocation5], 0  ;;  %s276_s12 = smov [#allocation3]   ;;  %s204_s16 = scalar_lea.hbm %s358_s0, 256 }
   0x3   :  { %s16_s13 = sshll.u32 %s276_s12, 4  ;;  %p205_p0 = scmp.ne.s32.totalorder %s358_s0, %s204_s16  ;;  %s17_s13 = int_to_ptr.vmem [resolvable:$true] %s16_s13 }
   0x4   :  { %p208_p1 = scmp.lt.u32.totalorder %s204_s16, %s358_s0 }
   0x6   :  { %p210_p2 = pnand %p208_p1, %p205_p0 }
   0x8   :  { %213 = shalt.err (!%p210_p2)
}
   0x9   :  { %s214_s21 = scalar_lea.vmem %s17_s13, 256  ;;  %p219_p4 = scmp.lt.s32.totalorder %s17_s13, %s17_s13 }
   0xa   :  { %p215_p3 = scmp.ne.s32.totalorder %s17_s13, %s214_s21  ;;  %p220_p5 = scmp.lt.s32.totalorder %s214_s21, %s214_s21 }
   0xc   :  { %p221_p6 = por %p220_p5, %p219_p4 }
   0xe   :  { %p222_p7 = pnand %p221_p6, %p215_p3 }
  0x10   :  { %225 = shalt.err (!%p222_p7)
}
  0x11   :  { %s277_s22 = smov 128   ;;  %s278_s23 = smov 8  }
  0x12   :  { %22 = dma.hbm_to_vmem [thread:$0]  %s358_s0, 256, %s17_s13, [#allocation4], %s277_s22, %s277_s22, %s278_s23  }
  0x13   :  { %s279_s26 = smov [#allocation6]   ;;  %s226_s30 = scalar_lea.hbm %s359_s1, 256 }
  0x14   :  { %s28_s27 = sshll.u32 %s279_s26, 4  ;;  %p227_p8 = scmp.ne.s32.totalorder %s359_s1, %s226_s30  ;;  %s29_s27 = int_to_ptr.vmem [resolvable:$true] %s28_s27 }
  0x15   :  { %p230_p9 = scmp.lt.u32.totalorder %s226_s30, %s359_s1 }
  0x17   :  { %p232_p10 = pnand %p230_p9, %p227_p8 }
  0x19   :  { %235 = shalt.err (!%p232_p10)
}
  0x1a   :  { %s236_s8 = scalar_lea.vmem %s29_s27, 256  ;;  %p241_p12 = scmp.lt.s32.totalorder %s29_s27, %s29_s27 }
  0x1b   :  { %p237_p11 = scmp.ne.s32.totalorder %s29_s27, %s236_s8  ;;  %p242_p13 = scmp.lt.s32.totalorder %s236_s8, %s236_s8 }
  0x1d   :  { %p243_p0 = por %p242_p13, %p241_p12 }
  0x1f   :  { %p244_p1 = pnand %p243_p0, %p237_p11 }
  0x21   :  { %247 = shalt.err (!%p244_p1)
}
  0x22   :  { %s280_s0 = smov 64   ;;  %s281_s9 = smov 4  }
  0x23   :  { %34 = dma.hbm_to_vmem [thread:$0]  %s359_s1, 256, %s29_s27, [#allocation7], %s280_s0, %s280_s0, %s281_s9  }
  0x24   :  { %270 = dma.done.wait [#allocation4], 256  }
  0x25   :  { %271 = vsyncadd [#allocation4], 4294967040 }
  0x26   :  { %272 = dma.done.wait [#allocation7], 256  }
  0x27   :  { %273 = vsyncadd [#allocation7], 4294967040  ;;  %vm50_vm0 = vcmask 261120   ;;  %v48_v0 = vld [vmem:[#allocation3] sm:$0xff]  ;;  %v49_v1 = vld [vmem:[#allocation3 + $0x8] sm:$0xff]  ;;  %v282_v9 = vmov 0.0  }
  0x28   :  { %v51_v2 = vsel %vm50_vm0, %v48_v0, 0.0  ;;  %v57_v3 = vmul.f32 %v48_v0, %v48_v0  ;;  %v58_v4 = vmul.f32 %v49_v1, %v49_v1  ;;  %v54_v6 = vsel %vm50_vm0, %v49_v1, 0.0  ;;  %v198_v8 = vld [vmem:[#allocation6] sm:$0xff]   ;;  %181 = vmatprep.subr.bf16.mxu0 %v282_v9  ;;  %v199_v10 = vld [vmem:[#allocation6 + $0x8] sm:$0xff]   ;;  %s284_s13 = smov [#allocation8]  }
  0x29   :  { %52 = vadd.xlane.f32.xlu0 %v51_v2  ;;  %182 = vmatpush3.bf16.msra.mxu0 %v198_v8  ;;  %vm283_vm1 = vmmov 0   ;;  %v174_v35 = vld [vmem:[%s360_s2] ss:$0 sm:$0xff]  ;;  %s161_s14 = sshll.u32 %s284_s13, 4  ;;  %s162_s14 = int_to_ptr.vmem [resolvable:$true] %s161_s14 }
  0x2a   :  { %v59_v5 = vsel %vm50_vm0, %v57_v3, 0.0  ;;  %v62_v7 = vsel %vm50_vm0, %v58_v4, 0.0  ;;  %185 = vmatprep.mubr.msk.bf16.mxu0 %vm283_vm1, %v282_v9  ;;  %183 = vmatprep.subr.bf16.mxu0 %v282_v9  ;;  %s248_s15 = scalar_lea.vmem %s162_s14, 256  ;;  %p253_p3 = scmp.lt.s32.totalorder %s162_s14, %s162_s14 }
  0x2b   :  { %60 = vadd.xlane.f32.xlu1 %v59_v5  ;;  %p249_p2 = scmp.ne.s32.totalorder %s162_s14, %s248_s15  ;;  %p254_p4 = scmp.lt.s32.totalorder %s248_s15, %s248_s15 }
  0x2d   :  { %55 = vadd.xlane.f32.xlu0 %v54_v6  ;;  %184 = vmatpush3.bf16.msra.mxu0 %v199_v10  ;;  %p255_p5 = por %p254_p4, %p253_p3 }
  0x2f   :  { %63 = vadd.xlane.f32.xlu1 %v62_v7  ;;  %p256_p6 = pnand %p255_p5, %p249_p2 }
  0xb6   :  { %v53_v11 = vpop.xlane.xlu0 %52 }
  0xb7   :  { %v65_v12 = vmul.f32 0.03125, %v53_v11 }
  0xb8   :  { %v61_v13 = vpop.xlane.xlu1 %60 }
  0xb9   :  { %v69_v14 = vmul.f32 %v65_v12, %v65_v12  ;;  %v67_v15 = vmul.f32 0.03125, %v61_v13  ;;  %v75_v28 = vsub.f32 %v48_v0, %v65_v12 }
  0xba   :  { %v56_v16 = vpop.xlane.xlu0 %55 }
  0xbb   :  { %v71_v17 = vsub.f32 %v67_v15, %v69_v14  ;;  %v66_v18 = vmul.f32 0.03125, %v56_v16 }
  0xbc   :  { %v64_v19 = vpop.xlane.xlu1 %63 }
  0xbd   :  { %v73_v20 = vmax.f32 %v71_v17, 0.0  ;;  %v70_v21 = vmul.f32 %v66_v18, %v66_v18  ;;  %v68_v22 = vmul.f32 0.03125, %v64_v19  ;;  %v76_v29 = vsub.f32 %v49_v1, %v66_v18 }
  0xbf   :  { %v77_v23 = vadd.f32 1e-05, %v73_v20  ;;  %v72_v24 = vsub.f32 %v68_v22, %v70_v21 }
  0xc1   :  { %v74_v25 = vmax.f32 %v72_v24, 0.0  ;;  %200 = vrsqrt.f32 %v77_v23 }
  0xc3   :  { %v78_v26 = vadd.f32 1e-05, %v74_v25 }
  0xc5   :  { %202 = vrsqrt.f32 %v78_v26 }
  0xcb   :  { %v201_v27 = vpop.eup %200 }
  0xcc   :  { %v81_v31 = vmul.f32 %v201_v27, %v75_v28 }
  0xcf   :  { %v203_v30 = vpop.eup %202 }
  0xd0   :  { %v82_v32 = vmul.f32 %v203_v30, %v76_v29 }
  0xd2   :  { %v83_v33 = vpack.c.bf16 %v82_v32, %v81_v31 }
  0xd4   :  { %84 = vst.msk [vmem:[#allocation2] sm:$0xff] %vm50_vm0, %v83_v33 }
  0xdb   :  { %v85_v34 = vld [vmem:[#allocation2] sm:$0xff] }
  0xdc   :  { %186 = vmatmul.mubr.msk.bf16.vlgmr.msra.gmra.mrb[0].mxu0 %vm50_vm0, %v85_v34 }
 0x1af   :  { %v147_v36 = vpop.f32.mrb[0].mxu0 }
 0x1b0   :  { %v148_v37 = vadd.f32 %v174_v35, %v147_v36  ;;  %v187_v38 = vpop.f32.mrb[1].mxu0 }
 0x1b1   :  { %v150_v39 = vpop.f32.mrb[2].mxu0 }
 0x1b2   :  { %154 = vst.msk [vmem:[#allocation8] sm:$0xff] %vm50_vm0, %v148_v37  ;;  %v151_v40 = vadd.f32 %v174_v35, %v150_v39  ;;  %v188_v41 = vpop.f32.mrb[3].mxu0 }
 0x1b4   :  { %155 = vst.msk [vmem:[#allocation8 + $0x8] sm:$0xff] %vm50_vm0, %v151_v40 }
 0x1b5   :  { %259 = shalt.err (!%p256_p6)
}
 0x1b6   :  { %s260_s17 = scalar_lea.hbm %s361_s3, 256 }
 0x1b7   :  { %p261_p7 = scmp.ne.s32.totalorder %s361_s3, %s260_s17  ;;  %p264_p8 = scmp.lt.u32.totalorder %s260_s17, %s361_s3 }
 0x1b9   :  { %p266_p9 = pnand %p264_p8, %p261_p7 }
 0x1bb   :  { %269 = shalt.err (!%p266_p9)
}
 0x1bc   :  { %167 = dma.vmem_to_hbm [thread:$0]  %s162_s14, 256, %s361_s3, [#allocation5], %s277_s22, %s277_s22, %s278_s23  }
 0x1bd   :  { %274 = dma.done.wait [#allocation5], 256  }
 0x1be   :  { %275 = vsyncadd [#allocation5], 4294967040 }
 0x1bf   :  { %171 = vsyncpa [#allocation4], 1 }
 0x1c0   :  { %172 = vsyncpa [#allocation7], 1 }
 0x1c1   :  { %173 = vsyncpa [#allocation5], 1 }

</bundles_post_ra>
